<compile_context>
chip_gen: v7x
topology: tpu7x:2x2x1
jax: 0.10.0
libtpu: 0.0.40
codegen_flags: <defaults>
</compile_context>

<pallas_src>
import functools

import jax
import jax.numpy as jnp
from jax import lax
from jax.experimental import pallas as pl
from jax.experimental.pallas import tpu as pltpu


def _downsample_kernel(x_ref, w_ref, b_ref, o_ref, col_ref, *, TH, Wo, C):
    """One (batch, output-row-tile) block per grid step.

    x_ref:   (1, 1, 2*TH+2, Wo+1, 2*C)  padded input tile in column-pair layout (compute dtype)
    w_ref:   (9*C, C)                   im2col weight matrix, rows ordered (kh, kw, c_in)
    b_ref:   (1, C)                     bias (f32)
    o_ref:   (1, 1, TH*Wo, C)           output tile
    col_ref: (TH, Wo, 9*C)              VMEM scratch holding the im2col matrix
    """
    x = x_ref[0, 0]                                     # (2*TH+2, Wo+1, 2*C)

    # Even/odd padded rows via a free leading-dim reshape (no strided slicing anywhere).
    xp = x.reshape(TH + 1, 2, Wo + 1, 2 * C)
    ev = xp[:, 0]                                       # padded rows 0, 2, ..., 2*TH
    od = xp[:, 1]                                       # padded rows 1, 3, ..., 2*TH+1
    row_plane = (ev[:TH], od[:TH], ev[1:TH + 1])        # rows feeding taps kh = 0, 1, 2

    # Assemble the (TH, Wo, 9*C) im2col block from 9 unit-stride slabs.
    for kh in range(3):
        rows = row_plane[kh]                            # (TH, Wo+1, 2*C)
        for kw in range(3):
            j0 = 1 if kw == 2 else 0                    # coarse-column offset (pair index)
            c0 = C if kw == 1 else 0                    # lane offset inside the column pair
            tap = rows[:, j0:j0 + Wo, c0:c0 + C]        # (TH, Wo, C)
            kt = kh * 3 + kw
            col_ref[:, :, kt * C:(kt + 1) * C] = tap

    # Single fused MXU matmul with K = 9*C, f32 accumulation; one bias add.
    patches = col_ref[...].reshape(TH * Wo, 9 * C)
    acc = jnp.dot(patches, w_ref[...], preferred_element_type=jnp.float32)
    acc = acc + b_ref[...]                              # (1, C) broadcast, f32
    o_ref[0, 0] = acc.astype(o_ref.dtype)


def _pick_tile_rows(ho: int, max_rows: int = 8) -> int:
    """Largest divisor of `ho` that is <= max_rows, preferring >= 2 row tiles."""
    if ho <= 1:
        return 1
    cap = max(1, min(max_rows, ho // 2))
    for th in range(cap, 0, -1):
        if ho % th == 0:
            return th
    return 1


@functools.partial(jax.jit, static_argnames=("compute_dtype", "max_tile_rows"))
def downsample_pallas(x_nchw, weight_oihw, bias, *,
                      compute_dtype=jnp.bfloat16, max_tile_rows=8):
    """Equivalent of nn.Conv2d(C, C, 3, stride=2, padding=1)(x_nchw).

    x_nchw:      (N, C, H, W)
    weight_oihw: (C, C, 3, 3)   PyTorch layout (out, in, kh, kw)
    bias:        (C,)
    returns:     (N, C, Ho, Wo) with Ho = ceil(H/2), Wo = ceil(W/2), dtype of x_nchw.

    compute_dtype: dtype fed to the MXU (bf16 by default; accumulation is always f32).
                   Pass jnp.float32 for exact f32-conv parity.
    """
    N, C, H, W = x_nchw.shape
    Ho = (H + 1) // 2
    Wo = (W + 1) // 2
    TH = _pick_tile_rows(Ho, max_tile_rows)
    T = Ho // TH
    L = 2 * TH + 2            # padded input rows per tile (incl. 1-row halo + 1 spare)
    Hp = 2 * Ho + 2           # padded height (top pad 1, bottom pad >= 1)
    Wp = 2 * Wo + 2           # padded width  (left pad 1, right pad >= 1)

    # ---- wrapper-side layout (fuses into ~one XLA pass over the input) ----------------------
    # TODO(synk): accept/return NHWC at the API boundary to drop the NCHW<->NHWC transposes.
    x_nhwc = jnp.transpose(x_nchw, (0, 2, 3, 1)).astype(compute_dtype)
    x_pad = jnp.pad(x_nhwc, ((0, 0), (1, Hp - 1 - H), (1, Wp - 1 - W), (0, 0)))
    # Free reshape into column-pair layout: lane axis holds [col 2j | col 2j+1] x channels.
    x_cs = x_pad.reshape(N, Hp, Wo + 1, 2 * C)
    # Per-row-tile slabs with the halo row baked in (static slices; only T-1 rows duplicated).
    x_tiles = jnp.stack([x_cs[:, 2 * t * TH: 2 * t * TH + L] for t in range(T)], axis=1)
    # x_tiles: (N, T, L, Wo+1, 2*C)

    # Weights as an im2col (9*C, C) matrix (rows ordered kh, kw, c_in); bias as (1, C) f32.
    w_mat = jnp.transpose(weight_oihw, (2, 3, 1, 0)).reshape(9 * C, C).astype(compute_dtype)
    b_mat = bias.reshape(1, C).astype(jnp.float32)

    kernel = functools.partial(_downsample_kernel, TH=TH, Wo=Wo, C=C)

    in_item = jnp.dtype(compute_dtype).itemsize
    out_item = jnp.dtype(x_nchw.dtype).itemsize
    block_bytes = (
        2 * (L * (Wo + 1) * 2 * C) * in_item            # double-buffered input tile
        + 2 * (9 * C * C) * in_item + 2 * C * 4         # weights + bias
        + 2 * (TH * Wo * C) * out_item                  # double-buffered output tile
        + (TH * Wo * 9 * C) * in_item                   # im2col scratch
    )
    vmem_limit = int(min(max(4 * block_bytes + (4 << 20), 16 << 20), 64 << 20))

    out_tiles = pl.pallas_call(
        kernel,
        out_shape=jax.ShapeDtypeStruct((N, T, TH * Wo, C), x_nchw.dtype),
        grid_spec=pltpu.PrefetchScalarGridSpec(
            num_scalar_prefetch=0,
            grid=(N, T),
            in_specs=[
                pl.BlockSpec((1, 1, L, Wo + 1, 2 * C), lambda n, t: (n, t, 0, 0, 0)),
                pl.BlockSpec((9 * C, C), lambda n, t: (0, 0)),
                pl.BlockSpec((1, C), lambda n, t: (0, 0)),
            ],
            out_specs=pl.BlockSpec((1, 1, TH * Wo, C), lambda n, t: (n, t, 0, 0)),
            scratch_shapes=[pltpu.VMEM((TH, Wo, 9 * C), compute_dtype)],
        ),
        compiler_params=pltpu.CompilerParams(
            dimension_semantics=("parallel", "parallel"),
            vmem_limit_bytes=vmem_limit,
        ),
    )(x_tiles, w_mat, b_mat)

    # (N, T, TH*Wo, C) -> (N, Ho, Wo, C) is a pure (free) reshape; transpose back to NCHW.
    out_nhwc = out_tiles.reshape(N, Ho, Wo, C)
    return jnp.transpose(out_nhwc, (0, 3, 1, 2))


def _reference_conv(x_nchw, weight_oihw, bias, compute_dtype):
    # Same input quantization as the kernel (bf16-cast), conv/accumulation in f32.
    xq = x_nchw.astype(compute_dtype).astype(jnp.float32)
    wq = weight_oihw.astype(compute_dtype).astype(jnp.float32)
    out = lax.conv_general_dilated(
        xq, wq, window_strides=(2, 2), padding=((1, 1), (1, 1)),
        dimension_numbers=("NCHW", "OIHW", "NCHW"),
        precision=lax.Precision.HIGHEST,
    )
    return out + bias[None, :, None, None].astype(jnp.float32)


if __name__ == "__main__":
    key = jax.random.PRNGKey(0)
    k_x, k_w, k_b = jax.random.split(key, 3)

    N, C, H, W = 2, 4, 16, 16
    x = jax.random.normal(k_x, (N, C, H, W), dtype=jnp.float32)

    # Deterministic parameter init (synthetic; mimics Conv2d parameter shapes).
    fan_in = C * 3 * 3
    bound = 1.0 / (fan_in ** 0.5)
    weight = jax.random.uniform(k_w, (C, C, 3, 3), jnp.float32, -bound, bound)
    bias = jax.random.uniform(k_b, (C,), jnp.float32, -bound, bound)

    out = downsample_pallas(x, weight, bias)
    out = jax.block_until_ready(out)

    ref = _reference_conv(x, weight, bias, jnp.bfloat16)
    assert out.shape == (N, C, (H + 1) // 2, (W + 1) // 2), out.shape
    assert out.dtype == x.dtype, out.dtype
    max_err = float(jnp.max(jnp.abs(out - ref)))
    assert jnp.allclose(out, ref, atol=1e-3, rtol=1e-3), f"mismatch vs reference conv: {max_err}"

    print("KERNEL_OK")
</pallas_src>

<mosaic_0001>
module attributes {stable_mosaic.version = 11 : i64} {
  func.func @_downsample_kernel(%arg0: i32, %arg1: i32, %arg2: memref<1x1x10x9x8xbf16, #tpu.memory_space<vmem>>, %arg3: memref<36x4xbf16, #tpu.memory_space<vmem>>, %arg4: memref<1x4xf32, #tpu.memory_space<vmem>>, %arg5: memref<1x1x32x4xf32, #tpu.memory_space<vmem>>, %arg6: memref<4x8x36xbf16, #tpu.memory_space<vmem>>) attributes {dimension_semantics = [#tpu.dimension_semantics<parallel>, #tpu.dimension_semantics<parallel>], iteration_bounds = array<i64: 2, 2>, scalar_prefetch = 0 : i64, scratch_operands = 1 : i64, tpu.core_type = #tpu.core_type<tc>, window_params = [{transform_indices = @transform_0, window_bounds = array<i64: 1, 1, 10, 9, 8>}, {pipeline_mode = #tpu.pipeline_mode<synchronous>, transform_indices = @transform_1, window_bounds = array<i64: 36, 4>}, {pipeline_mode = #tpu.pipeline_mode<synchronous>, transform_indices = @transform_2, window_bounds = array<i64: 1, 4>}, {transform_indices = @transform_3, window_bounds = array<i64: 1, 1, 32, 4>}]} {
    %c0 = arith.constant 0 : index
    %c0_0 = arith.constant 0 : index
    %c0_1 = arith.constant 0 : index
    %c0_2 = arith.constant 0 : index
    %c0_3 = arith.constant 0 : index
    %0 = vector.load %arg2[%c0, %c0_0, %c0_1, %c0_2, %c0_3] : memref<1x1x10x9x8xbf16, #tpu.memory_space<vmem>>, vector<1x1x10x9x8xbf16>
    %1 = vector.shape_cast %0 : vector<1x1x10x9x8xbf16> to vector<10x9x8xbf16>
    %2 = vector.shape_cast %1 : vector<10x9x8xbf16> to vector<5x2x9x8xbf16>
    %3 = vector.extract_strided_slice %2 {offsets = [0, 0, 0, 0], sizes = [5, 1, 9, 8], strides = [1, 1, 1, 1]} : vector<5x2x9x8xbf16> to vector<5x1x9x8xbf16>
    %4 = vector.shape_cast %3 : vector<5x1x9x8xbf16> to vector<5x9x8xbf16>
    %5 = vector.extract_strided_slice %2 {offsets = [0, 1, 0, 0], sizes = [5, 1, 9, 8], strides = [1, 1, 1, 1]} : vector<5x2x9x8xbf16> to vector<5x1x9x8xbf16>
    %6 = vector.shape_cast %5 : vector<5x1x9x8xbf16> to vector<5x9x8xbf16>
    %7 = vector.extract_strided_slice %4 {offsets = [0, 0, 0], sizes = [4, 9, 8], strides = [1, 1, 1]} : vector<5x9x8xbf16> to vector<4x9x8xbf16>
    %8 = vector.extract_strided_slice %6 {offsets = [0, 0, 0], sizes = [4, 9, 8], strides = [1, 1, 1]} : vector<5x9x8xbf16> to vector<4x9x8xbf16>
    %9 = vector.extract_strided_slice %4 {offsets = [1, 0, 0], sizes = [4, 9, 8], strides = [1, 1, 1]} : vector<5x9x8xbf16> to vector<4x9x8xbf16>
    %10 = vector.extract_strided_slice %7 {offsets = [0, 0, 0], sizes = [4, 8, 4], strides = [1, 1, 1]} : vector<4x9x8xbf16> to vector<4x8x4xbf16>
    %c0_4 = arith.constant 0 : index
    %c0_5 = arith.constant 0 : index
    %c0_6 = arith.constant 0 : index
    %11 = vector.load %arg6[%c0_4, %c0_5, %c0_6] : memref<4x8x36xbf16, #tpu.memory_space<vmem>>, vector<4x8x4xbf16>
    tpu.vector_store %arg6[%c0_4, %c0_5, %c0_6], %10 {strides = array<i32>} : memref<4x8x36xbf16, #tpu.memory_space<vmem>>, vector<4x8x4xbf16>,
    %12 = vector.extract_strided_slice %7 {offsets = [0, 0, 4], sizes = [4, 8, 4], strides = [1, 1, 1]} : vector<4x9x8xbf16> to vector<4x8x4xbf16>
    %c0_7 = arith.constant 0 : index
    %c0_8 = arith.constant 0 : index
    %c4 = arith.constant 4 : index
    %13 = vector.load %arg6[%c0_7, %c0_8, %c4] : memref<4x8x36xbf16, #tpu.memory_space<vmem>>, vector<4x8x4xbf16>
    tpu.vector_store %arg6[%c0_7, %c0_8, %c4], %12 {strides = array<i32>} : memref<4x8x36xbf16, #tpu.memory_space<vmem>>, vector<4x8x4xbf16>,
    %14 = vector.extract_strided_slice %7 {offsets = [0, 1, 0], sizes = [4, 8, 4], strides = [1, 1, 1]} : vector<4x9x8xbf16> to vector<4x8x4xbf16>
    %c0_9 = arith.constant 0 : index
    %c0_10 = arith.constant 0 : index
    %c8 = arith.constant 8 : index
    %15 = vector.load %arg6[%c0_9, %c0_10, %c8] : memref<4x8x36xbf16, #tpu.memory_space<vmem>>, vector<4x8x4xbf16>
    tpu.vector_store %arg6[%c0_9, %c0_10, %c8], %14 {strides = array<i32>} : memref<4x8x36xbf16, #tpu.memory_space<vmem>>, vector<4x8x4xbf16>,
    %16 = vector.extract_strided_slice %8 {offsets = [0, 0, 0], sizes = [4, 8, 4], strides = [1, 1, 1]} : vector<4x9x8xbf16> to vector<4x8x4xbf16>
    %c0_11 = arith.constant 0 : index
    %c0_12 = arith.constant 0 : index
    %c12 = arith.constant 12 : index
    %17 = vector.load %arg6[%c0_11, %c0_12, %c12] : memref<4x8x36xbf16, #tpu.memory_space<vmem>>, vector<4x8x4xbf16>
    tpu.vector_store %arg6[%c0_11, %c0_12, %c12], %16 {strides = array<i32>} : memref<4x8x36xbf16, #tpu.memory_space<vmem>>, vector<4x8x4xbf16>,
    %18 = vector.extract_strided_slice %8 {offsets = [0, 0, 4], sizes = [4, 8, 4], strides = [1, 1, 1]} : vector<4x9x8xbf16> to vector<4x8x4xbf16>
    %c0_13 = arith.constant 0 : index
    %c0_14 = arith.constant 0 : index
    %c16 = arith.constant 16 : index
    %19 = vector.load %arg6[%c0_13, %c0_14, %c16] : memref<4x8x36xbf16, #tpu.memory_space<vmem>>, vector<4x8x4xbf16>
    tpu.vector_store %arg6[%c0_13, %c0_14, %c16], %18 {strides = array<i32>} : memref<4x8x36xbf16, #tpu.memory_space<vmem>>, vector<4x8x4xbf16>,
    %20 = vector.extract_strided_slice %8 {offsets = [0, 1, 0], sizes = [4, 8, 4], strides = [1, 1, 1]} : vector<4x9x8xbf16> to vector<4x8x4xbf16>
    %c0_15 = arith.constant 0 : index
    %c0_16 = arith.constant 0 : index
    %c20 = arith.constant 20 : index
    %21 = vector.load %arg6[%c0_15, %c0_16, %c20] : memref<4x8x36xbf16, #tpu.memory_space<vmem>>, vector<4x8x4xbf16>
    tpu.vector_store %arg6[%c0_15, %c0_16, %c20], %20 {strides = array<i32>} : memref<4x8x36xbf16, #tpu.memory_space<vmem>>, vector<4x8x4xbf16>,
    %22 = vector.extract_strided_slice %9 {offsets = [0, 0, 0], sizes = [4, 8, 4], strides = [1, 1, 1]} : vector<4x9x8xbf16> to vector<4x8x4xbf16>
    %c0_17 = arith.constant 0 : index
    %c0_18 = arith.constant 0 : index
    %c24 = arith.constant 24 : index
    %23 = vector.load %arg6[%c0_17, %c0_18, %c24] : memref<4x8x36xbf16, #tpu.memory_space<vmem>>, vector<4x8x4xbf16>
    tpu.vector_store %arg6[%c0_17, %c0_18, %c24], %22 {strides = array<i32>} : memref<4x8x36xbf16, #tpu.memory_space<vmem>>, vector<4x8x4xbf16>,
    %24 = vector.extract_strided_slice %9 {offsets = [0, 0, 4], sizes = [4, 8, 4], strides = [1, 1, 1]} : vector<4x9x8xbf16> to vector<4x8x4xbf16>
    %c0_19 = arith.constant 0 : index
    %c0_20 = arith.constant 0 : index
    %c28 = arith.constant 28 : index
    %25 = vector.load %arg6[%c0_19, %c0_20, %c28] : memref<4x8x36xbf16, #tpu.memory_space<vmem>>, vector<4x8x4xbf16>
    tpu.vector_store %arg6[%c0_19, %c0_20, %c28], %24 {strides = array<i32>} : memref<4x8x36xbf16, #tpu.memory_space<vmem>>, vector<4x8x4xbf16>,
    %26 = vector.extract_strided_slice %9 {offsets = [0, 1, 0], sizes = [4, 8, 4], strides = [1, 1, 1]} : vector<4x9x8xbf16> to vector<4x8x4xbf16>
    %c0_21 = arith.constant 0 : index
    %c0_22 = arith.constant 0 : index
    %c32 = arith.constant 32 : index
    %27 = vector.load %arg6[%c0_21, %c0_22, %c32] : memref<4x8x36xbf16, #tpu.memory_space<vmem>>, vector<4x8x4xbf16>
    tpu.vector_store %arg6[%c0_21, %c0_22, %c32], %26 {strides = array<i32>} : memref<4x8x36xbf16, #tpu.memory_space<vmem>>, vector<4x8x4xbf16>,
    %c0_23 = arith.constant 0 : index
    %c0_24 = arith.constant 0 : index
    %c0_25 = arith.constant 0 : index
    %28 = vector.load %arg6[%c0_23, %c0_24, %c0_25] : memref<4x8x36xbf16, #tpu.memory_space<vmem>>, vector<4x8x36xbf16>
    %29 = vector.shape_cast %28 : vector<4x8x36xbf16> to vector<32x36xbf16>
    %c0_26 = arith.constant 0 : index
    %c0_27 = arith.constant 0 : index
    %30 = vector.load %arg3[%c0_26, %c0_27] : memref<36x4xbf16, #tpu.memory_space<vmem>>, vector<36x4xbf16>
    %cst = arith.constant dense<0.000000e+00> : vector<32x4xf32>
    %31 = tpu.matmul %29, %30, %cst {dimension_numbers = #tpu.dot_dimension_numbers<[1], [0], [0], [1], [0, 0, 1, 1], [], []>} : vector<32x36xbf16>, vector<36x4xbf16>, vector<32x4xf32> -> vector<32x4xf32>
    %c0_28 = arith.constant 0 : index
    %c0_29 = arith.constant 0 : index
    %32 = vector.load %arg4[%c0_28, %c0_29] : memref<1x4xf32, #tpu.memory_space<vmem>>, vector<1x4xf32>
    %33 = vector.broadcast %32 : vector<1x4xf32> to vector<32x4xf32>
    %34 = arith.addf %31, %33 : vector<32x4xf32>
    %c0_30 = arith.constant 0 : index
    %c0_31 = arith.constant 0 : index
    %c0_32 = arith.constant 0 : index
    %c0_33 = arith.constant 0 : index
    %35 = vector.load %arg5[%c0_30, %c0_31, %c0_32, %c0_33] : memref<1x1x32x4xf32, #tpu.memory_space<vmem>>, vector<1x1x32x4xf32>
    %36 = vector.shape_cast %35 : vector<1x1x32x4xf32> to vector<32x4xf32>
    %37 = vector.shape_cast %34 : vector<32x4xf32> to vector<1x1x32x4xf32>
    tpu.vector_store %arg5[%c0_30, %c0_31, %c0_32, %c0_33], %37 {strides = array<i32>} : memref<1x1x32x4xf32, #tpu.memory_space<vmem>>, vector<1x1x32x4xf32>,
    return
  }
  func.func @transform_0(%arg0: i32, %arg1: i32) -> (i32, i32, i32, i32, i32) {
    %c0_i32 = arith.constant 0 : i32
    %c0_i32_0 = arith.constant 0 : i32
    %c0_i32_1 = arith.constant 0 : i32
    %c0_i32_2 = arith.constant 0 : i32
    return %arg0, %arg1, %c0_i32, %c0_i32_0, %c0_i32_1 : i32, i32, i32, i32, i32
  }
  func.func @transform_1(%arg0: i32, %arg1: i32) -> (i32, i32) {
    %c0_i32 = arith.constant 0 : i32
    %c0_i32_0 = arith.constant 0 : i32
    %c0_i32_1 = arith.constant 0 : i32
    return %c0_i32, %c0_i32_0 : i32, i32
  }
  func.func @transform_2(%arg0: i32, %arg1: i32) -> (i32, i32) {
    %c0_i32 = arith.constant 0 : i32
    %c0_i32_0 = arith.constant 0 : i32
    %c0_i32_1 = arith.constant 0 : i32
    return %c0_i32, %c0_i32_0 : i32, i32
  }
  func.func @transform_3(%arg0: i32, %arg1: i32) -> (i32, i32, i32, i32) {
    %c0_i32 = arith.constant 0 : i32
    %c0_i32_0 = arith.constant 0 : i32
    %c0_i32_1 = arith.constant 0 : i32
    return %arg0, %arg1, %c0_i32, %c0_i32_0 : i32, i32, i32, i32
  }
}

</mosaic_0001>

<bundles_post_ra>
// kernel: downsample_pallas.1
= control target key start
LH: loop header
LB: loop body
LE: loop exit
PB: predicated region body
PF: predicated region fallthrough
CT: control target
= control target key end

     0   :  { %s821_s12 = smov 0   ;;  %s823_s13 = smov 0   ;;  %s1004_s0 = inlined_call_operand.vmem [shape: bf16[2,2,10,9,8], index: 0, kind: input, shape index: {}]   ;;  %s1005_s1 = inlined_call_operand.vmem [shape: bf16[36,4], index: 1, kind: input, shape index: {}]   ;;  %s1006_s2 = inlined_call_operand.vmem [shape: f32[1,4], index: 2, kind: input, shape index: {}]   ;;  %s1007_s3 = inlined_call_operand.vmem [shape: f32[2,2,32,4], index: 3, kind: output, shape index: {}]  }
   0x1   :  { %s825_s14 = smov 0   ;;  %s827_s15 = smov 0  }
   0x2   :  { %s829_s16 = smov 0  }
   0x3 LB: > { %s22_s17 = sadd.s32 1, %s786_s14  ;;  %s25_s18 = sadd.s32 1, %s790_s15  ;;  %s794_s16 = sphi %s829_s16, %s13_s16   ;;  %s790_s15 = sphi %s827_s15, %s1013_s15   ;;  %s786_s14 = sphi %s825_s14, %s1012_s14   ;;  %s782_s13 = sphi %s823_s13, %s1011_s13   ;;  %s778_s12 = sphi %s821_s12, %s1010_s12  }
   0x4   : > { %p23_p0 = scmp.ge.s32.totalorder %s22_s17, 2  ;;  %p673_p1 = scmp.ge.s32.totalorder %s794_s16, 1 }
   0x5   : > { %p157_p2 = scmp.lt.s32.totalorder %s794_s16, 5 }
   0x6   : > { %s1015_s17 = smov (%p23_p0, %s22_s17), 0  ;;  %s1017_s18 = smov (!%p23_p0, %s25_s18), %s790_s15 }
   0x7   : > { %p158_p3 = pnand %p673_p1, %p157_p2  ;;  %p27_p4 = scmp.ge.s32.totalorder %s1017_s18, 2 }
   0x8   : > { %p189_p5 = scmp.lt.s32.totalorder (!%p158_p3), %s782_s13, 1  ;;  %p191_p6 = scmp.lt.s32.totalorder (!%p158_p3), %s778_s12, 1  ;;  %vm236_vm0 = vsmask.f32 (!%p158_p3), 3328  ;;  %vm237_vm1 = vsmask.f32 (!%p158_p3), 7440 }
   0x9   : > { %s1019_s18 = smov (%p27_p4, %s1017_s18), 0  ;;  %161 = sbr.rel (%p158_p3) target bundleno = 410 (0x19a), region = 32 }
   0xa   : > { %vm226_vm2 = vcmask (!%p158_p3), 27648   ;;  %vm231_vm3 = vcmask (!%p158_p3), 60448   ;;  %s796_s26 = smov (!%p158_p3), 12   ;;  %vm920_vm4 = vmor (!%p158_p3), %vm236_vm0, %vm237_vm1  ;;  %s797_s27 = smov (!%p158_p3), 8   ;;  %vm516_vm5 = vcmask (!%p158_p3), 1041408   ;;  %vm307_vm6 = vcmask (!%p158_p3), 93248  }
   0xb   : > { %s798_s28 = smov (!%p158_p3), 20   ;;  %s799_s4 = smov (!%p158_p3), 24   ;;  %vm328_vm7 = vcmask (!%p158_p3), 126048   ;;  %vm333_vm8 = vcmask (!%p158_p3), 158848   ;;  %vm406_vm9 = vcmask (!%p158_p3), 191648   ;;  %vm427_vm10 = vcmask (!%p158_p3), 224448  }
   0xc   : > { %s800_s9 = smov (!%p158_p3), 32   ;;  %vm432_vm11 = vcmask (!%p158_p3), 257248   ;;  %vm463_vm12 = vcmask (!%p158_p3), 290048   ;;  %vm509_vm13 = vcmask (!%p158_p3), 293888   ;;  %vm569_vm14 = vcmask (!%p158_p3), 31744  }
  0x10   : > { %s1021_s13 = smov (!%p189_p5, %s782_s13), 1  ;;  %s1023_s12 = smov (!%p191_p6, %s778_s12), 1 }
  0x11   : > { %s705_s19 = smul.u32 40, %s1021_s13  ;;  %s675_s10 = sshll.u32 %s1023_s12, 2 }
  0x12   : > { %s704_s20 = smul.u32 20, %s1023_s12  ;;  %s676_s11 = sshll.u32 %s1021_s13, 3 }
  0x14   : > { %s195_s21 = sadd.s32 %s705_s19, %s704_s20  ;;  %s972_s19 = sadd.s32 %s676_s11, %s675_s10 }
  0x15   : > { %s674_s22 = sshll.u32 %s195_s21, 2  ;;  %s677_s12 = sshll.u32 %s972_s19, 3 }
  0x16   : > { %s860_s25 = scalar_lea.vmem %s1004_s0, %s674_s22  ;;  %s206_s23 = scalar_lea.vmem %s1007_s3, %s677_s12 }
  0x17   : > { %v214_v0 = vld [vmem:[%s860_s25 + $0x18] sm:$0xf]  ;;  %v210_v1 = vld [vmem:[%s860_s25 + $0x8] sm:$0xf]  ;;  %v867_v12 = vld [vmem:[%s860_s25 + $0x20] sm:$0xf] }
  0x18   : > { %v222_v2 = vld [vmem:[%s860_s25 + $0x38] sm:$0xf]  ;;  %318 = vrot.lane.b32.xlu1 %v214_v0, %s796_s26  ;;  %v353_v3 = vshrl.u32 %v214_v0, 16  ;;  %v356_v4 = vshll.u32 %v214_v0, 16  ;;  %316 = vrot.lane.b32.xlu0 %v210_v1, %s796_s26  ;;  %v339_v5 = vshrl.u32 %v210_v1, 16  ;;  %v342_v6 = vshll.u32 %v210_v1, 16 }
  0x19   : > { %v218_v7 = vld [vmem:[%s860_s25 + $0x28] sm:$0xf]  ;;  %v381_v8 = vshrl.u32 %v222_v2, 16  ;;  %v384_v9 = vshll.u32 %v222_v2, 16  ;;  %v217_v17 = vld [vmem:[%s860_s25 + $0x24] sm:$0x1] }
  0x1a   : > { %v367_v10 = vshrl.u32 %v218_v7, 16  ;;  %v370_v11 = vshll.u32 %v218_v7, 16  ;;  %v869_v13 = vrot.slane %v353_v3, 4  ;;  %v871_v14 = vrot.slane %v356_v4, 5  ;;  %229 = vst.msk [vmem:[#allocation2 + $0x8] sm:$0xf] %vm226_vm2, %v867_v12 }
  0x1b   : > { %v873_v15 = vrot.slane %v339_v5, 4  ;;  %v875_v16 = vrot.slane %v342_v6, 5  ;;  %v880_v18 = vrot.slane %v381_v8, 4  ;;  %v882_v19 = vrot.slane %v384_v9, 5  ;;  %v208_v22 = vld [vmem:[%s860_s25] sm:$0xf] }
  0x1c   : > { %v884_v20 = vrot.slane %v367_v10, 4  ;;  %v886_v21 = vrot.slane %v370_v11, 5  ;;  %234 = vst.msk [vmem:[#allocation2 + $0x8] sm:$0xf] %vm231_vm3, %v867_v12  ;;  %322 = vrot.lane.b32.xlu1 %v222_v2, %s796_s26  ;;  %320 = vrot.lane.b32.xlu0 %v218_v7, %s796_s26  ;;  %v268_v23 = vshrl.u32 %v867_v12, 16  ;;  %v271_v24 = vshll.u32 %v867_v12, 16 }
  0x1d   : > { %v209_v25 = vld [vmem:[%s860_s25 + $0x4] sm:$0x1]  ;;  %v895_v26 = vld [vmem:[%s860_s25 + $0x30] sm:$0xf]  ;;  %227 = vst.msk [vmem:[#allocation2] sm:$0xf] %vm226_vm2, %v208_v22  ;;  %v359_v27 = vor.u32 %v871_v14, %v869_v13  ;;  %v345_v36 = vor.u32 %v875_v16, %v873_v15  ;;  %v387_v61 = vor.u32 %v882_v19, %v880_v18 }
  0x1e   : > { %v277_v28 = vshll.u32 %v217_v17, 16  ;;  %v240_v29 = vshrl.u32 %v208_v22, 16  ;;  %v221_v30 = vld [vmem:[%s860_s25 + $0x34] sm:$0x1]  ;;  %v902_v31 = vld [vmem:[%s860_s25 + $0x10] sm:$0xf]  ;;  %v373_v13 = vor.u32 %v886_v21, %v884_v20 }
  0x1f   : > { %230 = vst.msk [vmem:[#allocation2 + $0xc] sm:$0xf] %vm226_vm2, %v895_v26  ;;  %v270_v32 = vrot.slane %v268_v23, 4  ;;  %v273_v33 = vrot.slane %v271_v24, 5  ;;  %v243_v34 = vshll.u32 %v208_v22, 16  ;;  %v249_v35 = vshll.u32 %v209_v25, 16 }
  0x20   : > { %232 = vst.msk [vmem:[#allocation2] sm:$0xf] %vm231_vm3, %v208_v22  ;;  %235 = vst.msk [vmem:[#allocation2 + $0xc] sm:$0xf] %vm231_vm3, %v895_v26  ;;  %v242_v37 = vrot.slane %v240_v29, 4  ;;  %v282_v38 = vshrl.u32 %v895_v26, 16 }
  0x21   : > { %228 = vst.msk [vmem:[#allocation2 + $0x4] sm:$0xf] %vm226_vm2, %v902_v31  ;;  %v285_v39 = vshll.u32 %v895_v26, 16  ;;  %v213_v40 = vld [vmem:[%s860_s25 + $0x14] sm:$0x1]  ;;  %v274_v41 = vor.u32 %v273_v33, %v270_v32  ;;  %v279_v42 = vrot.slane %v277_v28, 5 }
  0x22   : > { %233 = vst.msk [vmem:[#allocation2 + $0x4] sm:$0xf] %vm231_vm3, %v902_v31  ;;  %v245_v43 = vrot.slane %v243_v34, 5  ;;  %v291_v44 = vshll.u32 %v221_v30, 16  ;;  %v284_v46 = vrot.slane %v282_v38, 4  ;;  %v254_v48 = vshrl.u32 %v902_v31, 16 }
  0x23   : > { %v287_v47 = vrot.slane %v285_v39, 5  ;;  %v257_v49 = vshll.u32 %v902_v31, 16  ;;  %v215_v50 = vld [vmem:[%s860_s25 + $0x1c] sm:$0x1]  ;;  %v275_v51 = vrot.slane %v274_v41, 4  ;;  %v251_v53 = vrot.slane %v249_v35, 5 }
  0x24   : > { %v246_v52 = vor.u32 %v245_v43, %v242_v37  ;;  %v263_v54 = vshll.u32 %v213_v40, 16  ;;  %v211_v55 = vld [vmem:[%s860_s25 + $0xc] sm:$0x1]  ;;  %v293_v57 = vrot.slane %v291_v44, 5  ;;  %v256_v58 = vrot.slane %v254_v48, 4  ;;  %v751_v30 = vld [vmem:[%s1005_s1] sm:$0xff]  }
  0x25   : > { %v288_v56 = vor.u32 %v287_v47, %v284_v46  ;;  %v259_v59 = vrot.slane %v257_v49, 5  ;;  %v223_v60 = vld [vmem:[%s860_s25 + $0x3c] sm:$0x1]  ;;  %v933_v62 = vsel %vm920_vm4, %v275_v51, %v279_v42  ;;  %v362_v0 = vshll.u32 %v215_v50, 16  ;;  %v219_v5 = vld [vmem:[%s860_s25 + $0x2c] sm:$0x1]  ;;  %693 = vmatprep.subr.bf16.mxu0 %v751_v30 }
  0x26   : > { %v247_v63 = vrot.slane %v246_v52, 4  ;;  %299 = vrot.lane.b32.xlu1 %v933_v62, %s797_s27  ;;  %v265_v3 = vrot.slane %v263_v54, 5  ;;  %v348_v4 = vshll.u32 %v211_v55, 16  ;;  %v360_v7 = vrot.slane %v359_v27, 4  ;;  %v224_v23 = vld [vmem:[%s860_s25 + $0x40] sm:$0xf]  ;;  %694 = vmatpush3.bf16.msra.mxu0 %v751_v30 }
  0x27   : > { %v289_v1 = vrot.slane %v288_v56, 4  ;;  %v260_v2 = vor.u32 %v259_v59, %v256_v58  ;;  %v364_v8 = vrot.slane %v362_v0, 5  ;;  %v390_v9 = vshll.u32 %v223_v60, 16  ;;  %v225_v34 = vld [vmem:[%s860_s25 + $0x44] sm:$0x1]  ;;  %v752_v35 = vld [vmem:[%s1005_s1 + $0x8] sm:$0xff]  }
  0x28   : > { %v252_v6 = vsel %vm920_vm4, %v247_v63, %v251_v53  ;;  %v346_v14 = vrot.slane %v345_v36, 4  ;;  %v350_v15 = vrot.slane %v348_v4, 5  ;;  %v376_v16 = vshll.u32 %v219_v5, 16  ;;  %v753_v38 = vld [vmem:[%s1005_s1 + $0x10] ss:$0 sps:$4 sm:$0x33]   ;;  %695 = vmatprep.subr.bf16.mxu0 %v752_v35 }
  0x29   : > { %295 = vrot.lane.b32.xlu0 %v252_v6, %s797_s27  ;;  %v294_v10 = vsel %vm920_vm4, %v289_v1, %v293_v57  ;;  %v261_v11 = vrot.slane %v260_v2, 4  ;;  %v365_v18 = vsel %vm920_vm4, %v360_v7, %v364_v8  ;;  %v388_v19 = vrot.slane %v387_v61, 4 }
  0x2a   : > { %301 = vrot.lane.b32.xlu1 %v294_v10, %s797_s27  ;;  %v392_v22 = vrot.slane %v390_v9, 5  ;;  %v351_v24 = vsel %vm920_vm4, %v346_v14, %v350_v15  ;;  %v374_v25 = vrot.slane %v373_v13, 4  ;;  %v378_v20 = vrot.slane %v376_v16, 5  ;;  %696 = vmatpush3.bf16.msra.mxu0 %v752_v35 }
  0x2b   : > { %v266_v17 = vsel %vm920_vm4, %v261_v11, %v265_v3  ;;  %v438_v27 = vshrl.u32 %v224_v23, 16  ;;  %v441_v28 = vshll.u32 %v224_v23, 16  ;;  %v447_v37 = vshll.u32 %v225_v34, 16  ;;  %703 = vmatprep.subr.msk.bf16.mxu0 %vm516_vm5, %v753_v38 }
  0x2c   : > { %v393_v21 = vsel %vm920_vm4, %v388_v19, %v392_v22  ;;  %v379_v29 = vsel %vm920_vm4, %v374_v25, %v378_v20  ;;  %v518_v40 = vsel %vm516_vm5, %v753_v38, 0 }
  0x2d   : > { %297 = vrot.lane.b32.xlu0 %v266_v17, %s797_s27  ;;  %v440_v32 = vrot.slane %v438_v27, 4  ;;  %v443_v33 = vrot.slane %v441_v28, 5  ;;  %v449_v39 = vrot.slane %v447_v37, 5 }
  0x2e   : > { %396 = vrot.lane.b32.xlu1 %v365_v18, %s798_s28  ;;  %698 = vmatpush3.bf16.msra.mxu0 %v518_v40 }
  0x2f   : > { %v444_v36 = vor.u32 %v443_v33, %v440_v32 }
  0x31   : > { %394 = vrot.lane.b32.xlu0 %v351_v24, %s798_s28 }
  0x32   : > { %400 = vrot.lane.b32.xlu1 %v393_v21, %s798_s28 }
  0x35   : > { %398 = vrot.lane.b32.xlu0 %v379_v29, %s798_s28 }
  0x36   : > { %417 = vrot.lane.b32.xlu1 %v867_v12, %s799_s4  ;;  %v445_v12 = vrot.slane %v444_v36, 4 }
  0x38   : > { %v450_v41 = vsel %vm920_vm4, %v445_v12, %v449_v39 }
  0x39   : > { %415 = vrot.lane.b32.xlu0 %v902_v31, %s799_s4 }
  0x3a   : > { %421 = vrot.lane.b32.xlu1 %v224_v23, %s799_s4 }
  0x3d   : > { %419 = vrot.lane.b32.xlu0 %v895_v26, %s799_s4 }
  0x3e   : > { %453 = vrot.lane.b32.xlu1 %v933_v62, %s800_s9  ;;  %v678_v62 = vld [vmem:[%s1006_s2] ss:$0 sm:$0xff] }
  0x41   : > { %451 = vrot.lane.b32.xlu0 %v266_v17, %s800_s9 }
  0x42   : > { %457 = vrot.lane.b32.xlu1 %v450_v41, %s800_s9 }
  0x45   : > { %455 = vrot.lane.b32.xlu0 %v294_v10, %s800_s9 }
  0x8a   : > { %v319_v31 = vpop.permute.xlu1 %318  ;;  %v317_v42 = vpop.permute.xlu0 %316 }
  0x8e   : > { %v323_v43 = vpop.permute.xlu1 %322  ;;  %v321_v44 = vpop.permute.xlu0 %320 }
  0x98   : > { %v300_v26 = vpop.permute.xlu1 %299 }
  0x99   : > { %310 = vst.msk [vmem:[#allocation2 + $0x8] sm:$0xf] %vm307_vm6, %v300_v26 }
  0x9a   : > { %331 = vst.msk [vmem:[#allocation2 + $0x8] sm:$0xf] %vm328_vm7, %v321_v44 }
  0x9b   : > { %v296_v45 = vpop.permute.xlu0 %295  ;;  %336 = vst.msk [vmem:[#allocation2 + $0x8] sm:$0xf] %vm333_vm8, %v321_v44 }
  0x9c   : > { %308 = vst.msk [vmem:[#allocation2] sm:$0xf] %vm307_vm6, %v296_v45  ;;  %v302_v46 = vpop.permute.xlu1 %301 }
  0x9d   : > { %329 = vst.msk [vmem:[#allocation2] sm:$0xf] %vm328_vm7, %v317_v42 }
  0x9e   : > { %311 = vst.msk [vmem:[#allocation2 + $0xc] sm:$0xf] %vm307_vm6, %v302_v46 }
  0x9f   : > { %334 = vst.msk [vmem:[#allocation2] sm:$0xf] %vm333_vm8, %v317_v42  ;;  %v298_v47 = vpop.permute.xlu0 %297 }
  0xa0   : > { %332 = vst.msk [vmem:[#allocation2 + $0xc] sm:$0xf] %vm328_vm7, %v323_v43  ;;  %v397_v48 = vpop.permute.xlu1 %396 }
  0xa1   : > { %309 = vst.msk [vmem:[#allocation2 + $0x4] sm:$0xf] %vm307_vm6, %v298_v47 }
  0xa2   : > { %337 = vst.msk [vmem:[#allocation2 + $0xc] sm:$0xf] %vm333_vm8, %v323_v43 }
  0xa3   : > { %330 = vst.msk [vmem:[#allocation2 + $0x4] sm:$0xf] %vm328_vm7, %v319_v31  ;;  %v395_v49 = vpop.permute.xlu0 %394 }
  0xa4   : > { %335 = vst.msk [vmem:[#allocation2 + $0x4] sm:$0xf] %vm333_vm8, %v319_v31  ;;  %v401_v50 = vpop.permute.xlu1 %400 }
  0xa5   : > { %408 = vst.msk [vmem:[#allocation2 + $0x4] sm:$0xf] %vm406_vm9, %v397_v48  ;;  %407 = vst.msk [vmem:[#allocation2] sm:$0xf] %vm406_vm9, %v395_v49 }
  0xa6   : > { %410 = vst.msk [vmem:[#allocation2 + $0xc] sm:$0xf] %vm406_vm9, %v401_v50 }
  0xa7   : > { %v399_v51 = vpop.permute.xlu0 %398 }
  0xa8   : > { %409 = vst.msk [vmem:[#allocation2 + $0x8] sm:$0xf] %vm406_vm9, %v399_v51  ;;  %v418_v52 = vpop.permute.xlu1 %417 }
  0xa9   : > { %429 = vst.msk [vmem:[#allocation2 + $0x4] sm:$0xf] %vm427_vm10, %v418_v52 }
  0xaa   : > { %434 = vst.msk [vmem:[#allocation2 + $0x4] sm:$0xf] %vm432_vm11, %v418_v52 }
  0xab   : > { %v416_v53 = vpop.permute.xlu0 %415 }
  0xac   : > { %428 = vst.msk [vmem:[#allocation2] sm:$0xf] %vm427_vm10, %v416_v53  ;;  %v422_v54 = vpop.permute.xlu1 %421 }
  0xad   : > { %433 = vst.msk [vmem:[#allocation2] sm:$0xf] %vm432_vm11, %v416_v53 }
  0xae   : > { %431 = vst.msk [vmem:[#allocation2 + $0xc] sm:$0xf] %vm427_vm10, %v422_v54 }
  0xaf   : > { %436 = vst.msk [vmem:[#allocation2 + $0xc] sm:$0xf] %vm432_vm11, %v422_v54  ;;  %v420_v55 = vpop.permute.xlu0 %419 }
  0xb0   : > { %430 = vst.msk [vmem:[#allocation2 + $0x8] sm:$0xf] %vm427_vm10, %v420_v55  ;;  %v454_v56 = vpop.permute.xlu1 %453 }
  0xb1   : > { %435 = vst.msk [vmem:[#allocation2 + $0x8] sm:$0xf] %vm432_vm11, %v420_v55 }
  0xb2   : > { %465 = vst.msk [vmem:[#allocation2 + $0x4] sm:$0xf] %vm463_vm12, %v454_v56 }
  0xb3   : > { %v452_v57 = vpop.permute.xlu0 %451 }
  0xb4   : > { %464 = vst.msk [vmem:[#allocation2] sm:$0xf] %vm463_vm12, %v452_v57  ;;  %v458_v58 = vpop.permute.xlu1 %457 }
  0xb5   : > { %467 = vst.msk [vmem:[#allocation2 + $0xc] sm:$0xf] %vm463_vm12, %v458_v58 }
  0xb7   : > { %v456_v59 = vpop.permute.xlu0 %455 }
  0xb8   : > { %466 = vst.msk [vmem:[#allocation2 + $0x8] sm:$0xf] %vm463_vm12, %v456_v59 }
  0xbb   : > { %v754_v60 = vld [vmem:[#allocation2] sm:$0xff]  }
  0xbc   : > { %699 = vmatprep.mubr.msk.bf16.mxu0 %vm509_vm13, %v754_v60 }
  0xbf   : > { %v755_v61 = vld [vmem:[#allocation2 + $0x8] sm:$0xff]  }
  0xc0   : > { %700 = vmatmul.mubr.msk.bf16.vlgmr.msra.gmra.mrb[0].mxu0 %vm509_vm13, %v755_v61 }
 0x193   : > { %v701_v63 = vpop.f32.mrb[0].mxu0 }
 0x194   : > { %v563_v0 = vadd.f32 %v701_v63, %v678_v62  ;;  %v554_v1 = vpop.f32.mrb[1].mxu0 }
 0x195   : > { %v555_v2 = vadd.f32 %v678_v62, %v554_v1  ;;  %v702_v3 = vpop.f32.mrb[2].mxu0 }
 0x196   : > { %572 = vst.msk [vmem:[%s206_s23 + $0x10] sm:$0xff] %vm569_vm14, %v563_v0  ;;  %v566_v4 = vadd.f32 %v702_v3, %v678_v62  ;;  %v557_v5 = vpop.f32.mrb[3].mxu0 }
 0x197   : > { %570 = vst.msk [vmem:[%s206_s23] sm:$0xff] %vm569_vm14, %v555_v2  ;;  %v558_v6 = vadd.f32 %v678_v62, %v557_v5 }
 0x198   : > { %573 = vst.msk [vmem:[%s206_s23 + $0x18] sm:$0xff] %vm569_vm14, %v566_v4 }
 0x199   : > { %571 = vst.msk [vmem:[%s206_s23 + $0x8] sm:$0xff] %vm569_vm14, %v558_v6 }
 0x19a PF: > { %s13_s16 = sadd.s32 1, %s794_s16   ;;  %s1010_s12 = smov %s786_s14 }
 0x19b   : > { %p10_p7 = scmp.ge.s32.totalorder %s13_s16, 6   ;;  %s1011_s13 = smov %s790_s15 }
 0x19c   : > { %s1012_s14 = smov %s1015_s17  ;;  %s1013_s15 = smov %s1019_s18 }
 0x19d   :  { %12 = sbr.rel (!%p10_p7) target bundleno = 3 (0x3), region = 62 }

</bundles_post_ra>
